<compile_context>
chip_gen: v5e
topology: v5e:2x2
jax: 0.10.0
libtpu: 0.0.40
codegen_flags: <defaults>
</compile_context>

<pallas_src>
import jax
import jax.numpy as jnp
from jax.experimental import pallas as pl
from jax.experimental.pallas import tpu as pltpu


def _round_up(x, m):
    return (x + m - 1) // m * m


def _cdiv(a, b):
    return -(-a // b)


def _tpu_generation():
    """Best-effort TPU generation detection for per-chip tiling defaults."""
    try:
        kind = jax.devices()[0].device_kind.lower()
    except Exception:
        return 0
    if "v5" in kind:
        return 5
    if "v6" in kind:
        return 6
    if "v7" in kind or "7x" in kind:
        return 7
    return 0


def _pad_cast_2d(a, rows, cols, dtype):
    """Single fused pad+cast pass; a no-op when already aligned & right dtype."""
    r, c = a.shape
    if r == rows and c == cols:
        return a if a.dtype == dtype else a.astype(dtype)
    return jnp.zeros((rows, cols), dtype).at[:r, :c].set(a.astype(dtype))


# ---------------------------------------------------------------------------
# Kernels
# ---------------------------------------------------------------------------
def _mlp_bridge_kernel_masked(x_ref, m_ref, wm_ref, bm_ref, wed_ref, bed_ref,
                              o_ref):
    # sigmoid via a single EUP tanh (VPU does the cheap mul/add), f32 math.
    x = x_ref[...].astype(jnp.float32)                       # (TB, Kp)
    s = 0.5 * jnp.tanh(0.5 * x) + 0.5
    xm = (s * m_ref[...].astype(jnp.float32)).astype(jnp.bfloat16)

    # self.mlp : Linear(kwd_size -> hidden), bf16 MXU, f32 accumulation.
    feat = jnp.dot(xm, wm_ref[...],
                   preferred_element_type=jnp.float32) + bm_ref[...]

    # fused encoder_bridge | decoder_bridge : Linear(hidden -> E+D), one
    # lane-dense output slab instead of two narrow masked stores.
    out = jnp.dot(feat.astype(jnp.bfloat16), wed_ref[...],
                  preferred_element_type=jnp.float32) + bed_ref[...]
    o_ref[...] = out.astype(o_ref.dtype)


def _mlp_bridge_kernel_nomask(x_ref, wm_ref, bm_ref, wed_ref, bed_ref, o_ref):
    x = x_ref[...].astype(jnp.float32)
    s = (0.5 * jnp.tanh(0.5 * x) + 0.5).astype(jnp.bfloat16)
    feat = jnp.dot(s, wm_ref[...],
                   preferred_element_type=jnp.float32) + bm_ref[...]
    out = jnp.dot(feat.astype(jnp.bfloat16), wed_ref[...],
                  preferred_element_type=jnp.float32) + bed_ref[...]
    o_ref[...] = out.astype(o_ref.dtype)


# ---------------------------------------------------------------------------
# One-time parameter packing (do NOT re-run per forward call)
# ---------------------------------------------------------------------------
def pack_mlp_bridge_params(params):
    """Pad feature dims to 128 lanes, fuse encoder|decoder weights, cast to
    bf16 (biases stay f32). Run once; pass the result to mlp_bridge_forward."""
    Wm, bm = params["mlp_w"], params["mlp_b"]          # (K,H), (1,H)
    We, be = params["ebridge_w"], params["ebridge_b"]  # (H,E), (1,E)
    Wd, bd = params["dbridge_w"], params["dbridge_b"]  # (H,D), (1,D)
    K, H = Wm.shape
    E = We.shape[1]
    D = Wd.shape[1]
    Kp = _round_up(K, 128)
    Hp = _round_up(H, 128)
    Fp = _round_up(E + D, 128)

    wm = jnp.zeros((Kp, Hp), jnp.bfloat16).at[:K, :H].set(Wm.astype(jnp.bfloat16))
    bmp = jnp.zeros((1, Hp), jnp.float32).at[:, :H].set(
        bm.reshape(1, H).astype(jnp.float32))

    wed = (jnp.zeros((Hp, Fp), jnp.bfloat16)
           .at[:H, :E].set(We.astype(jnp.bfloat16))
           .at[:H, E:E + D].set(Wd.astype(jnp.bfloat16)))
    bedp = (jnp.zeros((1, Fp), jnp.float32)
            .at[:, :E].set(be.reshape(1, E).astype(jnp.float32))
            .at[:, E:E + D].set(bd.reshape(1, D).astype(jnp.float32)))

    return {"wm": wm, "bm": bmp, "wed": wed, "bed": bedp,
            "dims": (K, H, E, D)}


# ---------------------------------------------------------------------------
# Forward
# ---------------------------------------------------------------------------
def mlp_bridge_forward(logits, kwd_mask, packed, *, block_b=None):
    """logits: (B, kwd_size); kwd_mask: (B, kwd_size) or None.
    packed: output of pack_mlp_bridge_params()."""
    B, K = logits.shape
    K0, H, E, D = packed["dims"]
    assert K == K0, f"kwd_size mismatch: {K} vs packed {K0}"
    wm, bmp, wed, bedp = packed["wm"], packed["bm"], packed["wed"], packed["bed"]
    Kp, Hp = wm.shape
    Fp = wed.shape[1]

    gen = _tpu_generation()
    if block_b is None:
        # v5e/v6e: bigger tiles get closer to the HBM roofline (128 MiB VMEM).
        # v7x / unknown: stay conservative (64 MiB VMEM per TensorCore).
        block_b = 512 if gen in (5, 6) else 256
    vmem_limit = (64 << 20) if gen in (5, 6) else (32 << 20)

    # Batch tile: aim for >= 2 grid steps when possible (shards across v7x's
    # two TensorCores and overlaps x/out DMA with compute) while keeping the
    # number of padded rows small. Multiple of 16 sublanes (bf16 packing).
    n_blk = max(2, _cdiv(B, block_b))
    TB = max(16, min(block_b, _round_up(_cdiv(B, n_blk), 16)))
    Bp = _round_up(B, TB)
    grid = (Bp // TB,)

    # bf16 activation (and mask) streams: halves the dominant HBM input bytes.
    xs = _pad_cast_2d(logits, Bp, Kp, jnp.bfloat16)

    # TODO(synk): if (Kp*Hp + Hp*Fp) in bf16 exceeds ~20 MiB, the fully
    # VMEM-resident weight scheme below should be replaced (on v7x) by tiling
    # the fused projection over a second grid axis; not needed at these sizes.
    weight_specs = [
        pl.BlockSpec((Kp, Hp), lambda i: (0, 0)),   # mlp W (resident)
        pl.BlockSpec((1, Hp), lambda i: (0, 0)),    # mlp b
        pl.BlockSpec((Hp, Fp), lambda i: (0, 0)),   # fused e|d W (resident)
        pl.BlockSpec((1, Fp), lambda i: (0, 0)),    # fused e|d b
    ]
    x_spec = pl.BlockSpec((TB, Kp), lambda i: (i, 0))
    out_spec = pl.BlockSpec((TB, Fp), lambda i: (i, 0))

    if kwd_mask is None:
        kernel = _mlp_bridge_kernel_nomask
        in_specs = [x_spec] + weight_specs
        args = (xs, wm, bmp, wed, bedp)
    else:
        ms = _pad_cast_2d(kwd_mask, Bp, Kp, jnp.bfloat16)
        kernel = _mlp_bridge_kernel_masked
        m_spec = pl.BlockSpec((TB, Kp), lambda i: (i, 0))
        in_specs = [x_spec, m_spec] + weight_specs
        args = (xs, ms, wm, bmp, wed, bedp)

    out = pl.pallas_call(
        kernel,
        # Emit directly in the caller's dtype: no post-kernel cast pass.
        out_shape=jax.ShapeDtypeStruct((Bp, Fp), logits.dtype),
        grid_spec=pltpu.PrefetchScalarGridSpec(
            num_scalar_prefetch=0,
            grid=grid,
            in_specs=in_specs,
            out_specs=out_spec,
        ),
        compiler_params=pltpu.CompilerParams(
            dimension_semantics=("parallel",),   # batch shards over TCs
            vmem_limit_bytes=vmem_limit,
        ),
    )(*args)

    # Padded rows out[B:] contain bias-only garbage by construction; slice off.
    e_feat = out[:B, :E]
    d_feat = out[:B, E:E + D]
    return e_feat, d_feat


# ---------------------------------------------------------------------------
# Init + pure-JAX reference
# ---------------------------------------------------------------------------
def init_params(key, kwd_size, hidden_size, ebridge_dim, dbridge_dim):
    """Deterministic init mimicking torch.nn.Linear (uniform +-1/sqrt(fan_in))."""
    def linear(k, fan_in, fan_out):
        kw, kb = jax.random.split(k)
        bound = 1.0 / jnp.sqrt(fan_in)
        w = jax.random.uniform(kw, (fan_in, fan_out), jnp.float32, -bound, bound)
        b = jax.random.uniform(kb, (1, fan_out), jnp.float32, -bound, bound)
        return w, b

    k1, k2, k3 = jax.random.split(key, 3)
    mlp_w, mlp_b = linear(k1, kwd_size, hidden_size)
    e_w, e_b = linear(k2, hidden_size, ebridge_dim)
    d_w, d_b = linear(k3, hidden_size, dbridge_dim)
    return {"mlp_w": mlp_w, "mlp_b": mlp_b,
            "ebridge_w": e_w, "ebridge_b": e_b,
            "dbridge_w": d_w, "dbridge_b": d_b}


def _reference(logits, kwd_mask, params):
    x = jax.nn.sigmoid(logits)
    if kwd_mask is not None:
        x = x * kwd_mask
    feat = x @ params["mlp_w"] + params["mlp_b"]
    e = feat @ params["ebridge_w"] + params["ebridge_b"]
    d = feat @ params["dbridge_w"] + params["dbridge_b"]
    return e, d


if __name__ == "__main__":
    # small, module-consistent shapes (the kernel pays off at large B/K/H).
    batch = 8
    kwd_size = 32
    hidden_size = 32
    ebridge_dim = 16
    dbridge_dim = 16

    key = jax.random.PRNGKey(0)
    k_x, k_m, k_p = jax.random.split(key, 3)
    logits = jax.random.normal(k_x, (batch, kwd_size), jnp.float32)
    kwd_mask = (jax.random.uniform(k_m, (batch, kwd_size)) > 0.5).astype(jnp.float32)
    params = init_params(k_p, kwd_size, hidden_size, ebridge_dim, dbridge_dim)

    # One-time parameter prep (hoisted out of the forward path).
    packed = pack_mlp_bridge_params(params)

    e_feat, d_feat = mlp_bridge_forward(logits, kwd_mask, packed)
    e_nm, d_nm = mlp_bridge_forward(logits, None, packed)   # mask-free path
    jax.block_until_ready((e_feat, d_feat, e_nm, d_nm))

    # Reference is pure f32; kernel streams bf16 activations and uses the bf16
    # MXU (f32 accumulate), so tolerances are loosened accordingly. Expect the
    # absolute error to grow roughly with sqrt(K)+sqrt(H) for large K/H.
    e_ref, d_ref = _reference(logits, kwd_mask, params)
    e_ref_nm, d_ref_nm = _reference(logits, None, params)
    assert jnp.allclose(e_feat, e_ref, atol=5e-2, rtol=5e-2)
    assert jnp.allclose(d_feat, d_ref, atol=5e-2, rtol=5e-2)
    assert jnp.allclose(e_nm, e_ref_nm, atol=5e-2, rtol=5e-2)
    assert jnp.allclose(d_nm, d_ref_nm, atol=5e-2, rtol=5e-2)

    print("KERNEL_OK")
</pallas_src>

<mosaic_0001>
module attributes {stable_mosaic.version = 11 : i64} {
  func.func @_mlp_bridge_kernel_masked(%arg0: i32, %arg1: memref<16x128xbf16, #tpu.memory_space<vmem>>, %arg2: memref<16x128xbf16, #tpu.memory_space<vmem>>, %arg3: memref<128x128xbf16, #tpu.memory_space<vmem>>, %arg4: memref<1x128xf32, #tpu.memory_space<vmem>>, %arg5: memref<128x128xbf16, #tpu.memory_space<vmem>>, %arg6: memref<1x128xf32, #tpu.memory_space<vmem>>, %arg7: memref<16x128xf32, #tpu.memory_space<vmem>>) attributes {dimension_semantics = [#tpu.dimension_semantics<parallel>], iteration_bounds = array<i64: 1>, scalar_prefetch = 0 : i64, scratch_operands = 0 : i64, tpu.core_type = #tpu.core_type<tc>, window_params = [{transform_indices = @transform_0, window_bounds = array<i64: 16, 128>}, {transform_indices = @transform_1, window_bounds = array<i64: 16, 128>}, {pipeline_mode = #tpu.pipeline_mode<synchronous>, transform_indices = @transform_2, window_bounds = array<i64: 128, 128>}, {pipeline_mode = #tpu.pipeline_mode<synchronous>, transform_indices = @transform_3, window_bounds = array<i64: 1, 128>}, {pipeline_mode = #tpu.pipeline_mode<synchronous>, transform_indices = @transform_4, window_bounds = array<i64: 128, 128>}, {pipeline_mode = #tpu.pipeline_mode<synchronous>, transform_indices = @transform_5, window_bounds = array<i64: 1, 128>}, {transform_indices = @transform_6, window_bounds = array<i64: 16, 128>}]} {
    %c0 = arith.constant 0 : index
    %c0_0 = arith.constant 0 : index
    %0 = vector.load %arg1[%c0, %c0_0] : memref<16x128xbf16, #tpu.memory_space<vmem>>, vector<16x128xbf16>
    %1 = arith.extf %0 : vector<16x128xbf16> to vector<16x128xf32>
    %cst = arith.constant 5.000000e-01 : f32
    %2 = vector.broadcast %cst : f32 to vector<16x128xf32>
    %3 = arith.mulf %2, %1 : vector<16x128xf32>
    %4 = math.tanh %3 : vector<16x128xf32>
    %cst_1 = arith.constant 5.000000e-01 : f32
    %5 = vector.broadcast %cst_1 : f32 to vector<16x128xf32>
    %6 = arith.mulf %5, %4 : vector<16x128xf32>
    %cst_2 = arith.constant 5.000000e-01 : f32
    %7 = vector.broadcast %cst_2 : f32 to vector<16x128xf32>
    %8 = arith.addf %6, %7 : vector<16x128xf32>
    %c0_3 = arith.constant 0 : index
    %c0_4 = arith.constant 0 : index
    %9 = vector.load %arg2[%c0_3, %c0_4] : memref<16x128xbf16, #tpu.memory_space<vmem>>, vector<16x128xbf16>
    %10 = arith.extf %9 : vector<16x128xbf16> to vector<16x128xf32>
    %11 = arith.mulf %8, %10 : vector<16x128xf32>
    %12 = arith.truncf %11 : vector<16x128xf32> to vector<16x128xbf16>
    %c0_5 = arith.constant 0 : index
    %c0_6 = arith.constant 0 : index
    %13 = vector.load %arg3[%c0_5, %c0_6] : memref<128x128xbf16, #tpu.memory_space<vmem>>, vector<128x128xbf16>
    %cst_7 = arith.constant dense<0.000000e+00> : vector<16x128xf32>
    %14 = tpu.matmul %12, %13, %cst_7 {dimension_numbers = #tpu.dot_dimension_numbers<[1], [0], [0], [1], [0, 0, 1, 1], [], []>} : vector<16x128xbf16>, vector<128x128xbf16>, vector<16x128xf32> -> vector<16x128xf32>
    %c0_8 = arith.constant 0 : index
    %c0_9 = arith.constant 0 : index
    %15 = vector.load %arg4[%c0_8, %c0_9] : memref<1x128xf32, #tpu.memory_space<vmem>>, vector<1x128xf32>
    %16 = vector.broadcast %15 : vector<1x128xf32> to vector<16x128xf32>
    %17 = arith.addf %14, %16 : vector<16x128xf32>
    %18 = arith.truncf %17 : vector<16x128xf32> to vector<16x128xbf16>
    %c0_10 = arith.constant 0 : index
    %c0_11 = arith.constant 0 : index
    %19 = vector.load %arg5[%c0_10, %c0_11] : memref<128x128xbf16, #tpu.memory_space<vmem>>, vector<128x128xbf16>
    %cst_12 = arith.constant dense<0.000000e+00> : vector<16x128xf32>
    %20 = tpu.matmul %18, %19, %cst_12 {dimension_numbers = #tpu.dot_dimension_numbers<[1], [0], [0], [1], [0, 0, 1, 1], [], []>} : vector<16x128xbf16>, vector<128x128xbf16>, vector<16x128xf32> -> vector<16x128xf32>
    %c0_13 = arith.constant 0 : index
    %c0_14 = arith.constant 0 : index
    %21 = vector.load %arg6[%c0_13, %c0_14] : memref<1x128xf32, #tpu.memory_space<vmem>>, vector<1x128xf32>
    %22 = vector.broadcast %21 : vector<1x128xf32> to vector<16x128xf32>
    %23 = arith.addf %20, %22 : vector<16x128xf32>
    %c0_15 = arith.constant 0 : index
    %c0_16 = arith.constant 0 : index
    %24 = vector.load %arg7[%c0_15, %c0_16] : memref<16x128xf32, #tpu.memory_space<vmem>>, vector<16x128xf32>
    tpu.vector_store %arg7[%c0_15, %c0_16], %23 {strides = array<i32>} : memref<16x128xf32, #tpu.memory_space<vmem>>, vector<16x128xf32>,
    return
  }
  func.func @transform_0(%arg0: i32) -> (i32, i32) {
    %c0_i32 = arith.constant 0 : i32
    %c0_i32_0 = arith.constant 0 : i32
    return %arg0, %c0_i32 : i32, i32
  }
  func.func @transform_1(%arg0: i32) -> (i32, i32) {
    %c0_i32 = arith.constant 0 : i32
    %c0_i32_0 = arith.constant 0 : i32
    return %arg0, %c0_i32 : i32, i32
  }
  func.func @transform_2(%arg0: i32) -> (i32, i32) {
    %c0_i32 = arith.constant 0 : i32
    %c0_i32_0 = arith.constant 0 : i32
    %c0_i32_1 = arith.constant 0 : i32
    return %c0_i32, %c0_i32_0 : i32, i32
  }
  func.func @transform_3(%arg0: i32) -> (i32, i32) {
    %c0_i32 = arith.constant 0 : i32
    %c0_i32_0 = arith.constant 0 : i32
    %c0_i32_1 = arith.constant 0 : i32
    return %c0_i32, %c0_i32_0 : i32, i32
  }
  func.func @transform_4(%arg0: i32) -> (i32, i32) {
    %c0_i32 = arith.constant 0 : i32
    %c0_i32_0 = arith.constant 0 : i32
    %c0_i32_1 = arith.constant 0 : i32
    return %c0_i32, %c0_i32_0 : i32, i32
  }
  func.func @transform_5(%arg0: i32) -> (i32, i32) {
    %c0_i32 = arith.constant 0 : i32
    %c0_i32_0 = arith.constant 0 : i32
    %c0_i32_1 = arith.constant 0 : i32
    return %c0_i32, %c0_i32_0 : i32, i32
  }
  func.func @transform_6(%arg0: i32) -> (i32, i32) {
    %c0_i32 = arith.constant 0 : i32
    %c0_i32_0 = arith.constant 0 : i32
    return %arg0, %c0_i32 : i32, i32
  }
}

</mosaic_0001>

<bundles_post_ra>
// kernel: tpu_custom_call.1
= control target key start
LH: loop header
LB: loop body
LE: loop exit
PB: predicated region body
PF: predicated region fallthrough
CT: control target
= control target key end

     0   :  { %11 = vsyncpa [#allocation3], 0  ;;  %s590_s0 = inlined_call_operand.hbm [shape: bf16[16,128], index: 0, kind: input, shape index: {}]   ;;  %s591_s1 = inlined_call_operand.hbm [shape: bf16[16,128], index: 1, kind: input, shape index: {}]   ;;  %s592_s2 = inlined_call_operand.hbm [shape: bf16[128,128], index: 2, kind: input, shape index: {}]   ;;  %s593_s3 = inlined_call_operand.vmem [shape: f32[1,128], index: 3, kind: input, shape index: {}]   ;;  %s594_s4 = inlined_call_operand.hbm [shape: bf16[128,128], index: 4, kind: input, shape index: {}]   ;;  %s595_s5 = inlined_call_operand.vmem [shape: f32[1,128], index: 5, kind: input, shape index: {}]   ;;  %s596_s6 = inlined_call_operand.hbm [shape: f32[16,128], index: 6, kind: output, shape index: {}]  }
   0x1   :  { %12 = vsyncpa [#allocation6], 0 }
   0x2   :  { %13 = vsyncpa [#allocation9], 0 }
   0x3   :  { %14 = vsyncpa [#allocation4], 0  ;;  %s32_s23 = sshll.u32 %s591_s1, 4  ;;  %s525_s24 = smov [#allocation5]   ;;  %s33_s23 = int_to_ptr.hbm [resolvable:$true] %s32_s23 }
   0x4   :  { %s34_s25 = sshll.u32 %s525_s24, 4  ;;  %s19_s28 = sshll.u32 %s590_s0, 4  ;;  %s35_s25 = int_to_ptr.vmem [resolvable:$true] %s34_s25  ;;  %s20_s28 = int_to_ptr.hbm [resolvable:$true] %s19_s28 }
   0x5   :  { %s526_s29 = smov 64   ;;  %s527_s30 = smov 4  }
   0x6   :  { %40 = dma.hbm_to_vmem [thread:$0]  %s33_s23, 128, %s35_s25, [#allocation6], %s526_s29, %s526_s29, %s527_s30  }
   0x7   :  { %s528_s7 = smov [#allocation2]   ;;  %s45_s11 = sshll.u32 %s592_s2, 4  ;;  %s46_s11 = int_to_ptr.hbm [resolvable:$true] %s45_s11 }
   0x8   :  { %s21_s8 = sshll.u32 %s528_s7, 4  ;;  %s60_s13 = sshll.u32 %s594_s4, 4  ;;  %s22_s8 = int_to_ptr.vmem [resolvable:$true] %s21_s8  ;;  %s61_s13 = int_to_ptr.hbm [resolvable:$true] %s60_s13 }
   0x9   :  { %27 = dma.hbm_to_vmem [thread:$0]  %s20_s28, 128, %s22_s8, [#allocation3], %s526_s29, %s526_s29, %s527_s30  }
   0xa   :  { %s529_s14 = smov [#allocation7]   ;;  %s530_s0 = smov [#allocation8]  }
   0xb   :  { %s47_s15 = sshll.u32 %s529_s14, 4  ;;  %s62_s16 = sshll.u32 %s530_s0, 4  ;;  %s48_s15 = int_to_ptr.vmem [resolvable:$true] %s47_s15  ;;  %s63_s16 = int_to_ptr.vmem [resolvable:$true] %s62_s16 }
   0xc   :  { %53 = dma.hbm_to_vmem [thread:$0]  %s46_s11, 1024, %s48_s15, [#allocation6], %s526_s29, %s526_s29, %s527_s30  }
   0xd   :  { %68 = dma.hbm_to_vmem [thread:$0]  %s61_s13, 1024, %s63_s16, [#allocation9], %s526_s29, %s526_s29, %s527_s30  }
   0xe   :  { %517 = dma.done.wait [#allocation3], 128  }
   0xf   :  { %518 = vsyncadd [#allocation3], 4294967168 }
  0x10   :  { %519 = dma.done.wait [#allocation6], 1152  }
  0x11   :  { %520 = vsyncadd [#allocation6], 4294966144 }
  0x12   :  { %521 = dma.done.wait [#allocation9], 1024  }
  0x13   :  { %522 = vsyncadd [#allocation9], 4294966272  ;;  %v365_v0 = vld [vmem:[#allocation7 + $0x38] sm:$0xff]  ;;  %v364_v1 = vld [vmem:[#allocation7 + $0x30] sm:$0xff]  ;;  %s531_s19 = smov [#allocation10]   ;;  %s279_s23 = sshll.u32 %s596_s6, 4  ;;  %s280_s23 = int_to_ptr.hbm [resolvable:$true] %s279_s23 }
  0x14   :  { %174 = vmatpush.bf16.msra.mxu0 %v365_v0  ;;  %v375_v2 = vld [vmem:[#allocation2] sm:$0xff]   ;;  %v373_v5 = vld [vmem:[#allocation8 + $0x38] sm:$0xff]  ;;  %v363_v9 = vld [vmem:[#allocation7 + $0x28] sm:$0xff]  ;;  %s277_s20 = sshll.u32 %s531_s19, 4  ;;  %s533_s24 = smov 8   ;;  %s278_s20 = int_to_ptr.vmem [resolvable:$true] %s277_s20 }
  0x15   :  { %v376_v3 = vunpack.c.l.bf16 %v375_v2  ;;  %v377_v4 = vunpack.c.h.bf16 %v375_v2  ;;  %257 = vmatpush.bf16.msra.mxu1 %v373_v5  ;;  %v372_v8 = vld [vmem:[#allocation8 + $0x30] sm:$0xff]  ;;  %v371_v10 = vld [vmem:[#allocation8 + $0x28] sm:$0xff]  ;;  %v362_v11 = vld [vmem:[#allocation7 + $0x20] sm:$0xff] }
  0x16   :  { %v370_v13 = vld [vmem:[#allocation8 + $0x20] sm:$0xff]  ;;  %v361_v15 = vld [vmem:[#allocation7 + $0x18] sm:$0xff]  ;;  %v360_v19 = vld [vmem:[#allocation7 + $0x10] sm:$0xff] }
  0x17   :  { %v91_v6 = vmul.f32 0.5, %v376_v3  ;;  %v92_v7 = vmul.f32 0.5, %v377_v4  ;;  %v369_v18 = vld [vmem:[#allocation8 + $0x18] sm:$0xff]  ;;  %v359_v25 = vld [vmem:[#allocation7 + $0x8] sm:$0xff]  ;;  %v358_v28 = vld [vmem:[#allocation7] sm:$0xff] }
  0x18   :  { %175 = vmatpush.bf16.msra.mxu0 %v364_v1  ;;  %v379_v20 = vld [vmem:[#allocation5] sm:$0xff]   ;;  %v368_v30 = vld [vmem:[#allocation8 + $0x10] sm:$0xff]  ;;  %v367_v31 = vld [vmem:[#allocation8 + $0x8] sm:$0xff] }
  0x19   :  { %393 = vtanh.f32 %v91_v6  ;;  %258 = vmatpush.bf16.msra.mxu1 %v372_v8  ;;  %v380_v23 = vunpack.c.l.bf16 %v379_v20  ;;  %v381_v24 = vunpack.c.h.bf16 %v379_v20  ;;  %v366_v32 = vld [vmem:[#allocation8] sm:$0xff]  ;;  %v391_v34 = vld [vmem:[%s593_s3] ss:$0 sm:$0xff]  ;;  %s532_s3 = smov 128  }
  0x1a   :  { %395 = vtanh.f32 %v92_v7  ;;  %v392_v39 = vld [vmem:[%s595_s5] ss:$0 sm:$0xff] }
  0x1c   :  { %176 = vmatpush.bf16.msra.mxu0 %v363_v9 }
  0x1d   :  { %259 = vmatpush.bf16.msra.mxu1 %v371_v10 }
  0x1f   :  { %v394_v12 = vpop.eup %393 }
  0x20   :  { %v396_v14 = vpop.eup %395  ;;  %177 = vmatpush.bf16.msra.mxu0 %v362_v11  ;;  %v95_v16 = vmul.f32 0.5, %v394_v12 }
  0x21   :  { %v96_v17 = vmul.f32 0.5, %v396_v14  ;;  %260 = vmatpush.bf16.msra.mxu1 %v370_v13 }
  0x22   :  { %v97_v21 = vadd.f32 0.5, %v95_v16 }
  0x23   :  { %v98_v22 = vadd.f32 0.5, %v96_v17 }
  0x24   :  { %178 = vmatpush.bf16.msra.mxu0 %v361_v15  ;;  %v103_v26 = vmul.f32 %v380_v23, %v97_v21 }
  0x25   :  { %261 = vmatpush.bf16.msra.mxu1 %v369_v18  ;;  %v104_v27 = vmul.f32 %v381_v24, %v98_v22 }
  0x27   :  { %v105_v29 = vpack.c.bf16 %v104_v27, %v103_v26 }
  0x28   :  { %179 = vmatpush.bf16.msra.mxu0 %v360_v19 }
  0x29   :  { %262 = vmatpush.bf16.msra.mxu1 %v368_v30 }
  0x2c   :  { %180 = vmatpush.bf16.msra.mxu0 %v359_v25 }
  0x2d   :  { %263 = vmatpush.bf16.msra.mxu1 %v367_v31 }
  0x30   :  { %181 = vmatpush.bf16.msra.mxu0 %v358_v28 }
  0x31   :  { %264 = vmatpush.bf16.msra.mxu1 %v366_v32 }
  0x33   :  { %182 = vmatmul.bf16.vlgmr.msra.gmra.mxu0 %v105_v29 }
  0xb0   :  { %v183_v33 = vpop.f32.mrf.mxu0 }
  0xb1   :  { %v184_v36 = vadd.f32 %v391_v34, %v183_v33 }
  0xb8   :  { %v185_v35 = vpop.f32.mrf.mxu0 }
  0xb9   :  { %v186_v37 = vadd.f32 %v391_v34, %v185_v35 }
  0xbb   :  { %v188_v38 = vpack.c.bf16 %v186_v37, %v184_v36 }
  0xbd   :  { %265 = vmatmul.bf16.vlgmr.msra.gmra.mxu1 %v188_v38 }
 0x13a   :  { %v266_v40 = vpop.f32.mrf.mxu1 }
 0x13b   :  { %v267_v41 = vadd.f32 %v392_v39, %v266_v40 }
 0x13d   :  { %271 = vst [vmem:[#allocation10] sm:$0xff] %v267_v41 }
 0x142   :  { %v268_v42 = vpop.f32.mrf.mxu1 }
 0x143   :  { %v269_v43 = vadd.f32 %v392_v39, %v268_v42 }
 0x145   :  { %272 = vst [vmem:[#allocation10 + $0x8] sm:$0xff] %v269_v43 }
 0x146   :  { %285 = dma.vmem_to_hbm [thread:$0]  %s278_s20, 256, %s280_s23, [#allocation4], %s532_s3, %s532_s3, %s533_s24  }
 0x147   :  { %523 = dma.done.wait [#allocation4], 256  }
 0x148   :  { %524 = vsyncadd [#allocation4], 4294967040 }
 0x149   :  { %290 = vsyncpa [#allocation3], 1 }
 0x14a   :  { %291 = vsyncpa [#allocation6], 1 }
 0x14b   :  { %292 = vsyncpa [#allocation9], 1 }
 0x14c   :  { %293 = vsyncpa [#allocation4], 1 }

</bundles_post_ra>
